<compile_context>
chip_gen: v7x
topology: tpu7x:2x2x1
jax: 0.10.0
libtpu: 0.0.40
codegen_flags: <defaults>
</compile_context>

<pallas_src>
import jax
import jax.numpy as jnp
from jax.experimental import pallas as pl
from jax.experimental.pallas import tpu as pltpu


def _make_mlp_kernel(H):
    # Offsets into the flattened parameter vector (row-major concat of
    # w1(2,H), b1(H), w2(H,H), b2(H), w3(H,1), b3(1)).
    off_w1 = 0
    off_b1 = 2 * H
    off_w2 = 3 * H
    off_b2 = 3 * H + H * H
    off_w3 = 4 * H + H * H
    off_b3 = 5 * H + H * H

    def kernel(p_ref, x_ref, o_ref):
        # x_ref: (2, tile_n) -- batch on lanes.  p_ref: (5H+H*H+1,) in SMEM.
        x0 = x_ref[0:1, :]                                   # (1, tn)
        x1 = x_ref[1:2, :]                                   # (1, tn)

        # layer 1 + ReLU:  h1[j] = relu(w1[0,j]*x0 + w1[1,j]*x1 + b1[j])
        h1 = []
        for j in range(H):
            z = (p_ref[off_w1 + j] * x0
                 + p_ref[off_w1 + H + j] * x1
                 + p_ref[off_b1 + j])
            h1.append(jnp.maximum(z, 0.0))

        # layer 2 + ReLU:  h2[j] = relu(sum_i h1[i]*w2[i,j] + b2[j])
        h2 = []
        for j in range(H):
            acc = h1[0] * p_ref[off_w2 + j]
            for i in range(1, H):
                acc = acc + h1[i] * p_ref[off_w2 + i * H + j]
            h2.append(jnp.maximum(acc + p_ref[off_b2 + j], 0.0))

        # layer 3 + sigmoid:  z = sum_i h2[i]*w3[i] + b3
        acc = h2[0] * p_ref[off_w3]
        for i in range(1, H):
            acc = acc + h2[i] * p_ref[off_w3 + i]
        z3 = acc + p_ref[off_b3]
        o_ref[...] = 1.0 / (1.0 + jnp.exp(-z3))              # exp on EUP, lane-dense store

    return kernel


def mlp_forward(x, params, *, tile_n=1024):
    """x: (N, 2) float32.  Returns (N,) float32 (matches torch.flatten output)."""
    w1, b1, w2, b2, w3, b3 = params
    N = x.shape[0]
    H = w1.shape[1]

    # Flatten all ~51 parameters into one SMEM-resident vector.
    flat_params = jnp.concatenate([
        w1.reshape(-1), b1.reshape(-1),
        w2.reshape(-1), b2.reshape(-1),
        w3.reshape(-1), b3.reshape(-1),
    ]).astype(jnp.float32)

    # Ragged batch: pad to the tile, slice result back.
    n_tiles = pl.cdiv(N, tile_n)
    Np = n_tiles * tile_n
    xt = jnp.pad(x.astype(jnp.float32).T, ((0, 0), (0, Np - N)))   # (2, Np), batch on lanes

    kernel = _make_mlp_kernel(H)
    out = pl.pallas_call(
        kernel,
        out_shape=jax.ShapeDtypeStruct((1, Np), jnp.float32),
        grid_spec=pltpu.PrefetchScalarGridSpec(
            num_scalar_prefetch=0,
            grid=(n_tiles,),
            in_specs=[
                pl.BlockSpec(memory_space=pltpu.MemorySpace.SMEM),   # flat params (scalars)
                pl.BlockSpec((2, tile_n), lambda i: (0, i)),          # x tile, lane-dense
            ],
            out_specs=pl.BlockSpec((1, tile_n), lambda i: (0, i)),    # lane-dense output
        ),
        compiler_params=pltpu.CompilerParams(
            dimension_semantics=("parallel",)),
        cost_estimate=pl.CostEstimate(
            flops=2 * (2 * H + H * H + H) * N,
            transcendentals=N,
            bytes_accessed=12 * N),
    )(flat_params, xt)

    return out[0, :N]   # torch.flatten


def init_params(key, num_hidden=5):
    """Shapes match nn.Linear(2,H), (H,H), (H,1); weights stored as (in, out)."""
    k1, k2, k3, k4, k5, k6 = jax.random.split(key, 6)
    H = num_hidden
    w1 = jax.random.normal(k1, (2, H), jnp.float32) * 0.5
    b1 = jax.random.normal(k2, (H,), jnp.float32) * 0.1
    w2 = jax.random.normal(k3, (H, H), jnp.float32) * 0.5
    b2 = jax.random.normal(k4, (H,), jnp.float32) * 0.1
    w3 = jax.random.normal(k5, (H, 1), jnp.float32) * 0.5
    b3 = jax.random.normal(k6, (1,), jnp.float32) * 0.1
    return (w1, b1, w2, b2, w3, b3)


def mlp_reference(x, params):
    """Pure-JAX reference of the PyTorch forward."""
    w1, b1, w2, b2, w3, b3 = params
    a1 = jax.nn.relu(x @ w1 + b1)
    a2 = jax.nn.relu(a1 @ w2 + b2)
    a3 = jax.nn.sigmoid(a2 @ w3 + b3)
    return a3.reshape(-1)


if __name__ == "__main__":
    key = jax.random.PRNGKey(0)
    kx, kp = jax.random.split(key)

    num_hidden = 5
    batch = 300                    # deliberately not a multiple of the tile (ragged path)
    tile_n = 256                   # small tile for the test; default is 1024 for real N
    x = jax.random.normal(kx, (batch, 2), jnp.float32)
    params = init_params(kp, num_hidden)

    out = mlp_forward(x, params, tile_n=tile_n)
    out = jax.block_until_ready(out)

    ref = mlp_reference(x, params)
    assert out.shape == (batch,)
    assert jnp.allclose(out, ref, atol=1e-5, rtol=1e-5), (out, ref)

    print("KERNEL_OK")
</pallas_src>

<mosaic_0001>
module attributes {stable_mosaic.version = 11 : i64} {
  func.func @kernel(%arg0: i32, %arg1: memref<51xf32, #tpu.memory_space<smem>>, %arg2: memref<2x256xf32, #tpu.memory_space<vmem>>, %arg3: memref<1x256xf32, #tpu.memory_space<vmem>>) attributes {dimension_semantics = [#tpu.dimension_semantics<parallel>], iteration_bounds = array<i64: 2>, scalar_prefetch = 0 : i64, scratch_operands = 0 : i64, tpu.core_type = #tpu.core_type<tc>, window_params = [{transform_indices = @transform_0, window_bounds = array<i64: 51>}, {transform_indices = @transform_1, window_bounds = array<i64: 2, 256>}, {transform_indices = @transform_2, window_bounds = array<i64: 1, 256>}]} {
    %c0 = arith.constant 0 : index
    %c0_0 = arith.constant 0 : index
    %0 = vector.load %arg2[%c0, %c0_0] : memref<2x256xf32, #tpu.memory_space<vmem>>, vector<1x256xf32>
    %c1 = arith.constant 1 : index
    %c0_1 = arith.constant 0 : index
    %1 = vector.load %arg2[%c1, %c0_1] : memref<2x256xf32, #tpu.memory_space<vmem>>, vector<1x256xf32>
    %c0_2 = arith.constant 0 : index
    %2 = memref.load %arg1[%c0_2] : memref<51xf32, #tpu.memory_space<smem>>
    %3 = vector.broadcast %2 : f32 to vector<1x256xf32>
    %4 = arith.mulf %3, %0 : vector<1x256xf32>
    %c5 = arith.constant 5 : index
    %5 = memref.load %arg1[%c5] : memref<51xf32, #tpu.memory_space<smem>>
    %6 = vector.broadcast %5 : f32 to vector<1x256xf32>
    %7 = arith.mulf %6, %1 : vector<1x256xf32>
    %8 = arith.addf %4, %7 : vector<1x256xf32>
    %c10 = arith.constant 10 : index
    %9 = memref.load %arg1[%c10] : memref<51xf32, #tpu.memory_space<smem>>
    %10 = vector.broadcast %9 : f32 to vector<1x256xf32>
    %11 = arith.addf %8, %10 : vector<1x256xf32>
    %cst = arith.constant 0.000000e+00 : f32
    %12 = vector.broadcast %cst : f32 to vector<1x256xf32>
    %13 = arith.maximumf %11, %12 : vector<1x256xf32>
    %c1_3 = arith.constant 1 : index
    %14 = memref.load %arg1[%c1_3] : memref<51xf32, #tpu.memory_space<smem>>
    %15 = vector.broadcast %14 : f32 to vector<1x256xf32>
    %16 = arith.mulf %15, %0 : vector<1x256xf32>
    %c6 = arith.constant 6 : index
    %17 = memref.load %arg1[%c6] : memref<51xf32, #tpu.memory_space<smem>>
    %18 = vector.broadcast %17 : f32 to vector<1x256xf32>
    %19 = arith.mulf %18, %1 : vector<1x256xf32>
    %20 = arith.addf %16, %19 : vector<1x256xf32>
    %c11 = arith.constant 11 : index
    %21 = memref.load %arg1[%c11] : memref<51xf32, #tpu.memory_space<smem>>
    %22 = vector.broadcast %21 : f32 to vector<1x256xf32>
    %23 = arith.addf %20, %22 : vector<1x256xf32>
    %cst_4 = arith.constant 0.000000e+00 : f32
    %24 = vector.broadcast %cst_4 : f32 to vector<1x256xf32>
    %25 = arith.maximumf %23, %24 : vector<1x256xf32>
    %c2 = arith.constant 2 : index
    %26 = memref.load %arg1[%c2] : memref<51xf32, #tpu.memory_space<smem>>
    %27 = vector.broadcast %26 : f32 to vector<1x256xf32>
    %28 = arith.mulf %27, %0 : vector<1x256xf32>
    %c7 = arith.constant 7 : index
    %29 = memref.load %arg1[%c7] : memref<51xf32, #tpu.memory_space<smem>>
    %30 = vector.broadcast %29 : f32 to vector<1x256xf32>
    %31 = arith.mulf %30, %1 : vector<1x256xf32>
    %32 = arith.addf %28, %31 : vector<1x256xf32>
    %c12 = arith.constant 12 : index
    %33 = memref.load %arg1[%c12] : memref<51xf32, #tpu.memory_space<smem>>
    %34 = vector.broadcast %33 : f32 to vector<1x256xf32>
    %35 = arith.addf %32, %34 : vector<1x256xf32>
    %cst_5 = arith.constant 0.000000e+00 : f32
    %36 = vector.broadcast %cst_5 : f32 to vector<1x256xf32>
    %37 = arith.maximumf %35, %36 : vector<1x256xf32>
    %c3 = arith.constant 3 : index
    %38 = memref.load %arg1[%c3] : memref<51xf32, #tpu.memory_space<smem>>
    %39 = vector.broadcast %38 : f32 to vector<1x256xf32>
    %40 = arith.mulf %39, %0 : vector<1x256xf32>
    %c8 = arith.constant 8 : index
    %41 = memref.load %arg1[%c8] : memref<51xf32, #tpu.memory_space<smem>>
    %42 = vector.broadcast %41 : f32 to vector<1x256xf32>
    %43 = arith.mulf %42, %1 : vector<1x256xf32>
    %44 = arith.addf %40, %43 : vector<1x256xf32>
    %c13 = arith.constant 13 : index
    %45 = memref.load %arg1[%c13] : memref<51xf32, #tpu.memory_space<smem>>
    %46 = vector.broadcast %45 : f32 to vector<1x256xf32>
    %47 = arith.addf %44, %46 : vector<1x256xf32>
    %cst_6 = arith.constant 0.000000e+00 : f32
    %48 = vector.broadcast %cst_6 : f32 to vector<1x256xf32>
    %49 = arith.maximumf %47, %48 : vector<1x256xf32>
    %c4 = arith.constant 4 : index
    %50 = memref.load %arg1[%c4] : memref<51xf32, #tpu.memory_space<smem>>
    %51 = vector.broadcast %50 : f32 to vector<1x256xf32>
    %52 = arith.mulf %51, %0 : vector<1x256xf32>
    %c9 = arith.constant 9 : index
    %53 = memref.load %arg1[%c9] : memref<51xf32, #tpu.memory_space<smem>>
    %54 = vector.broadcast %53 : f32 to vector<1x256xf32>
    %55 = arith.mulf %54, %1 : vector<1x256xf32>
    %56 = arith.addf %52, %55 : vector<1x256xf32>
    %c14 = arith.constant 14 : index
    %57 = memref.load %arg1[%c14] : memref<51xf32, #tpu.memory_space<smem>>
    %58 = vector.broadcast %57 : f32 to vector<1x256xf32>
    %59 = arith.addf %56, %58 : vector<1x256xf32>
    %cst_7 = arith.constant 0.000000e+00 : f32
    %60 = vector.broadcast %cst_7 : f32 to vector<1x256xf32>
    %61 = arith.maximumf %59, %60 : vector<1x256xf32>
    %c15 = arith.constant 15 : index
    %62 = memref.load %arg1[%c15] : memref<51xf32, #tpu.memory_space<smem>>
    %63 = vector.broadcast %62 : f32 to vector<1x256xf32>
    %64 = arith.mulf %13, %63 : vector<1x256xf32>
    %c20 = arith.constant 20 : index
    %65 = memref.load %arg1[%c20] : memref<51xf32, #tpu.memory_space<smem>>
    %66 = vector.broadcast %65 : f32 to vector<1x256xf32>
    %67 = arith.mulf %25, %66 : vector<1x256xf32>
    %68 = arith.addf %64, %67 : vector<1x256xf32>
    %c25 = arith.constant 25 : index
    %69 = memref.load %arg1[%c25] : memref<51xf32, #tpu.memory_space<smem>>
    %70 = vector.broadcast %69 : f32 to vector<1x256xf32>
    %71 = arith.mulf %37, %70 : vector<1x256xf32>
    %72 = arith.addf %68, %71 : vector<1x256xf32>
    %c30 = arith.constant 30 : index
    %73 = memref.load %arg1[%c30] : memref<51xf32, #tpu.memory_space<smem>>
    %74 = vector.broadcast %73 : f32 to vector<1x256xf32>
    %75 = arith.mulf %49, %74 : vector<1x256xf32>
    %76 = arith.addf %72, %75 : vector<1x256xf32>
    %c35 = arith.constant 35 : index
    %77 = memref.load %arg1[%c35] : memref<51xf32, #tpu.memory_space<smem>>
    %78 = vector.broadcast %77 : f32 to vector<1x256xf32>
    %79 = arith.mulf %61, %78 : vector<1x256xf32>
    %80 = arith.addf %76, %79 : vector<1x256xf32>
    %c40 = arith.constant 40 : index
    %81 = memref.load %arg1[%c40] : memref<51xf32, #tpu.memory_space<smem>>
    %82 = vector.broadcast %81 : f32 to vector<1x256xf32>
    %83 = arith.addf %80, %82 : vector<1x256xf32>
    %cst_8 = arith.constant 0.000000e+00 : f32
    %84 = vector.broadcast %cst_8 : f32 to vector<1x256xf32>
    %85 = arith.maximumf %83, %84 : vector<1x256xf32>
    %c16 = arith.constant 16 : index
    %86 = memref.load %arg1[%c16] : memref<51xf32, #tpu.memory_space<smem>>
    %87 = vector.broadcast %86 : f32 to vector<1x256xf32>
    %88 = arith.mulf %13, %87 : vector<1x256xf32>
    %c21 = arith.constant 21 : index
    %89 = memref.load %arg1[%c21] : memref<51xf32, #tpu.memory_space<smem>>
    %90 = vector.broadcast %89 : f32 to vector<1x256xf32>
    %91 = arith.mulf %25, %90 : vector<1x256xf32>
    %92 = arith.addf %88, %91 : vector<1x256xf32>
    %c26 = arith.constant 26 : index
    %93 = memref.load %arg1[%c26] : memref<51xf32, #tpu.memory_space<smem>>
    %94 = vector.broadcast %93 : f32 to vector<1x256xf32>
    %95 = arith.mulf %37, %94 : vector<1x256xf32>
    %96 = arith.addf %92, %95 : vector<1x256xf32>
    %c31 = arith.constant 31 : index
    %97 = memref.load %arg1[%c31] : memref<51xf32, #tpu.memory_space<smem>>
    %98 = vector.broadcast %97 : f32 to vector<1x256xf32>
    %99 = arith.mulf %49, %98 : vector<1x256xf32>
    %100 = arith.addf %96, %99 : vector<1x256xf32>
    %c36 = arith.constant 36 : index
    %101 = memref.load %arg1[%c36] : memref<51xf32, #tpu.memory_space<smem>>
    %102 = vector.broadcast %101 : f32 to vector<1x256xf32>
    %103 = arith.mulf %61, %102 : vector<1x256xf32>
    %104 = arith.addf %100, %103 : vector<1x256xf32>
    %c41 = arith.constant 41 : index
    %105 = memref.load %arg1[%c41] : memref<51xf32, #tpu.memory_space<smem>>
    %106 = vector.broadcast %105 : f32 to vector<1x256xf32>
    %107 = arith.addf %104, %106 : vector<1x256xf32>
    %cst_9 = arith.constant 0.000000e+00 : f32
    %108 = vector.broadcast %cst_9 : f32 to vector<1x256xf32>
    %109 = arith.maximumf %107, %108 : vector<1x256xf32>
    %c17 = arith.constant 17 : index
    %110 = memref.load %arg1[%c17] : memref<51xf32, #tpu.memory_space<smem>>
    %111 = vector.broadcast %110 : f32 to vector<1x256xf32>
    %112 = arith.mulf %13, %111 : vector<1x256xf32>
    %c22 = arith.constant 22 : index
    %113 = memref.load %arg1[%c22] : memref<51xf32, #tpu.memory_space<smem>>
    %114 = vector.broadcast %113 : f32 to vector<1x256xf32>
    %115 = arith.mulf %25, %114 : vector<1x256xf32>
    %116 = arith.addf %112, %115 : vector<1x256xf32>
    %c27 = arith.constant 27 : index
    %117 = memref.load %arg1[%c27] : memref<51xf32, #tpu.memory_space<smem>>
    %118 = vector.broadcast %117 : f32 to vector<1x256xf32>
    %119 = arith.mulf %37, %118 : vector<1x256xf32>
    %120 = arith.addf %116, %119 : vector<1x256xf32>
    %c32 = arith.constant 32 : index
    %121 = memref.load %arg1[%c32] : memref<51xf32, #tpu.memory_space<smem>>
    %122 = vector.broadcast %121 : f32 to vector<1x256xf32>
    %123 = arith.mulf %49, %122 : vector<1x256xf32>
    %124 = arith.addf %120, %123 : vector<1x256xf32>
    %c37 = arith.constant 37 : index
    %125 = memref.load %arg1[%c37] : memref<51xf32, #tpu.memory_space<smem>>
    %126 = vector.broadcast %125 : f32 to vector<1x256xf32>
    %127 = arith.mulf %61, %126 : vector<1x256xf32>
    %128 = arith.addf %124, %127 : vector<1x256xf32>
    %c42 = arith.constant 42 : index
    %129 = memref.load %arg1[%c42] : memref<51xf32, #tpu.memory_space<smem>>
    %130 = vector.broadcast %129 : f32 to vector<1x256xf32>
    %131 = arith.addf %128, %130 : vector<1x256xf32>
    %cst_10 = arith.constant 0.000000e+00 : f32
    %132 = vector.broadcast %cst_10 : f32 to vector<1x256xf32>
    %133 = arith.maximumf %131, %132 : vector<1x256xf32>
    %c18 = arith.constant 18 : index
    %134 = memref.load %arg1[%c18] : memref<51xf32, #tpu.memory_space<smem>>
    %135 = vector.broadcast %134 : f32 to vector<1x256xf32>
    %136 = arith.mulf %13, %135 : vector<1x256xf32>
    %c23 = arith.constant 23 : index
    %137 = memref.load %arg1[%c23] : memref<51xf32, #tpu.memory_space<smem>>
    %138 = vector.broadcast %137 : f32 to vector<1x256xf32>
    %139 = arith.mulf %25, %138 : vector<1x256xf32>
    %140 = arith.addf %136, %139 : vector<1x256xf32>
    %c28 = arith.constant 28 : index
    %141 = memref.load %arg1[%c28] : memref<51xf32, #tpu.memory_space<smem>>
    %142 = vector.broadcast %141 : f32 to vector<1x256xf32>
    %143 = arith.mulf %37, %142 : vector<1x256xf32>
    %144 = arith.addf %140, %143 : vector<1x256xf32>
    %c33 = arith.constant 33 : index
    %145 = memref.load %arg1[%c33] : memref<51xf32, #tpu.memory_space<smem>>
    %146 = vector.broadcast %145 : f32 to vector<1x256xf32>
    %147 = arith.mulf %49, %146 : vector<1x256xf32>
    %148 = arith.addf %144, %147 : vector<1x256xf32>
    %c38 = arith.constant 38 : index
    %149 = memref.load %arg1[%c38] : memref<51xf32, #tpu.memory_space<smem>>
    %150 = vector.broadcast %149 : f32 to vector<1x256xf32>
    %151 = arith.mulf %61, %150 : vector<1x256xf32>
    %152 = arith.addf %148, %151 : vector<1x256xf32>
    %c43 = arith.constant 43 : index
    %153 = memref.load %arg1[%c43] : memref<51xf32, #tpu.memory_space<smem>>
    %154 = vector.broadcast %153 : f32 to vector<1x256xf32>
    %155 = arith.addf %152, %154 : vector<1x256xf32>
    %cst_11 = arith.constant 0.000000e+00 : f32
    %156 = vector.broadcast %cst_11 : f32 to vector<1x256xf32>
    %157 = arith.maximumf %155, %156 : vector<1x256xf32>
    %c19 = arith.constant 19 : index
    %158 = memref.load %arg1[%c19] : memref<51xf32, #tpu.memory_space<smem>>
    %159 = vector.broadcast %158 : f32 to vector<1x256xf32>
    %160 = arith.mulf %13, %159 : vector<1x256xf32>
    %c24 = arith.constant 24 : index
    %161 = memref.load %arg1[%c24] : memref<51xf32, #tpu.memory_space<smem>>
    %162 = vector.broadcast %161 : f32 to vector<1x256xf32>
    %163 = arith.mulf %25, %162 : vector<1x256xf32>
    %164 = arith.addf %160, %163 : vector<1x256xf32>
    %c29 = arith.constant 29 : index
    %165 = memref.load %arg1[%c29] : memref<51xf32, #tpu.memory_space<smem>>
    %166 = vector.broadcast %165 : f32 to vector<1x256xf32>
    %167 = arith.mulf %37, %166 : vector<1x256xf32>
    %168 = arith.addf %164, %167 : vector<1x256xf32>
    %c34 = arith.constant 34 : index
    %169 = memref.load %arg1[%c34] : memref<51xf32, #tpu.memory_space<smem>>
    %170 = vector.broadcast %169 : f32 to vector<1x256xf32>
    %171 = arith.mulf %49, %170 : vector<1x256xf32>
    %172 = arith.addf %168, %171 : vector<1x256xf32>
    %c39 = arith.constant 39 : index
    %173 = memref.load %arg1[%c39] : memref<51xf32, #tpu.memory_space<smem>>
    %174 = vector.broadcast %173 : f32 to vector<1x256xf32>
    %175 = arith.mulf %61, %174 : vector<1x256xf32>
    %176 = arith.addf %172, %175 : vector<1x256xf32>
    %c44 = arith.constant 44 : index
    %177 = memref.load %arg1[%c44] : memref<51xf32, #tpu.memory_space<smem>>
    %178 = vector.broadcast %177 : f32 to vector<1x256xf32>
    %179 = arith.addf %176, %178 : vector<1x256xf32>
    %cst_12 = arith.constant 0.000000e+00 : f32
    %180 = vector.broadcast %cst_12 : f32 to vector<1x256xf32>
    %181 = arith.maximumf %179, %180 : vector<1x256xf32>
    %c45 = arith.constant 45 : index
    %182 = memref.load %arg1[%c45] : memref<51xf32, #tpu.memory_space<smem>>
    %183 = vector.broadcast %182 : f32 to vector<1x256xf32>
    %184 = arith.mulf %85, %183 : vector<1x256xf32>
    %c46 = arith.constant 46 : index
    %185 = memref.load %arg1[%c46] : memref<51xf32, #tpu.memory_space<smem>>
    %186 = vector.broadcast %185 : f32 to vector<1x256xf32>
    %187 = arith.mulf %109, %186 : vector<1x256xf32>
    %188 = arith.addf %184, %187 : vector<1x256xf32>
    %c47 = arith.constant 47 : index
    %189 = memref.load %arg1[%c47] : memref<51xf32, #tpu.memory_space<smem>>
    %190 = vector.broadcast %189 : f32 to vector<1x256xf32>
    %191 = arith.mulf %133, %190 : vector<1x256xf32>
    %192 = arith.addf %188, %191 : vector<1x256xf32>
    %c48 = arith.constant 48 : index
    %193 = memref.load %arg1[%c48] : memref<51xf32, #tpu.memory_space<smem>>
    %194 = vector.broadcast %193 : f32 to vector<1x256xf32>
    %195 = arith.mulf %157, %194 : vector<1x256xf32>
    %196 = arith.addf %192, %195 : vector<1x256xf32>
    %c49 = arith.constant 49 : index
    %197 = memref.load %arg1[%c49] : memref<51xf32, #tpu.memory_space<smem>>
    %198 = vector.broadcast %197 : f32 to vector<1x256xf32>
    %199 = arith.mulf %181, %198 : vector<1x256xf32>
    %200 = arith.addf %196, %199 : vector<1x256xf32>
    %c50 = arith.constant 50 : index
    %201 = memref.load %arg1[%c50] : memref<51xf32, #tpu.memory_space<smem>>
    %202 = vector.broadcast %201 : f32 to vector<1x256xf32>
    %203 = arith.addf %200, %202 : vector<1x256xf32>
    %cst_13 = arith.constant 0.000000e+00 : f32
    %204 = vector.broadcast %cst_13 : f32 to vector<1x256xf32>
    %205 = arith.subf %204, %203 : vector<1x256xf32>
    %206 = math.exp %205 : vector<1x256xf32>
    %cst_14 = arith.constant 1.000000e+00 : f32
    %207 = vector.broadcast %cst_14 : f32 to vector<1x256xf32>
    %208 = arith.addf %207, %206 : vector<1x256xf32>
    %cst_15 = arith.constant 1.000000e+00 : f32
    %209 = vector.broadcast %cst_15 : f32 to vector<1x256xf32>
    %210 = arith.divf %209, %208 : vector<1x256xf32>
    %c0_16 = arith.constant 0 : index
    %c0_17 = arith.constant 0 : index
    %211 = vector.load %arg3[%c0_16, %c0_17] : memref<1x256xf32, #tpu.memory_space<vmem>>, vector<1x256xf32>
    tpu.vector_store %arg3[%c0_16, %c0_17], %210 {strides = array<i32>} : memref<1x256xf32, #tpu.memory_space<vmem>>, vector<1x256xf32>,
    return
  }
  func.func @transform_0(%arg0: i32) -> i32 {
    %c0_i32 = arith.constant 0 : i32
    %c0_i32_0 = arith.constant 0 : i32
    return %c0_i32 : i32
  }
  func.func @transform_1(%arg0: i32) -> (i32, i32) {
    %c0_i32 = arith.constant 0 : i32
    %c0_i32_0 = arith.constant 0 : i32
    return %c0_i32, %arg0 : i32, i32
  }
  func.func @transform_2(%arg0: i32) -> (i32, i32) {
    %c0_i32 = arith.constant 0 : i32
    %c0_i32_0 = arith.constant 0 : i32
    return %c0_i32, %arg0 : i32, i32
  }
}

</mosaic_0001>

<bundles_post_ra>
// kernel: tpu_custom_call.1
= control target key start
LH: loop header
LB: loop body
LE: loop exit
PB: predicated region body
PF: predicated region fallthrough
CT: control target
= control target key end

     0   :  { %7 = vsyncpa [#allocation5], 0  ;;  %s1110_s0 = inlined_call_operand.hbm [shape: f32[51], index: 0, kind: input, shape index: {}]   ;;  %s1111_s1 = inlined_call_operand.hbm [shape: f32[2,512], index: 1, kind: input, shape index: {}]   ;;  %s1112_s2 = inlined_call_operand.hbm [shape: f32[1,512], index: 2, kind: output, shape index: {}]  }
   0x1   :  { %8 = vsyncpa [#allocation3], 0 }
   0x2   :  { %10 = vsyncpa [#allocation3 + $0x1], 0 }
   0x3   :  { %11 = vsyncpa [#allocation4], 0 }
   0x4   :  { %13 = vsyncpa [#allocation4 + $0x1], 0  ;;  %s740_s9 = smov 0   ;;  %s742_s10 = smov 0  }
   0x5   :  { %s744_s11 = smov 0   ;;  %s746_s12 = smov 0  }
   0x6 LB: > { %s761_s13 = sadd.s32 4294967295, %s720_s12   ;;  %s477_s14 = sadd.s32 4294967294, %s720_s12   ;;  %s720_s12 = sphi %s746_s12, %s1133_s12   ;;  %s716_s11 = sphi %s744_s11, %s1132_s11   ;;  %s712_s10 = sphi %s742_s10, %s1131_s10   ;;  %s708_s9 = sphi %s740_s9, %s1130_s9  }
   0x7   : > { %p60_p0 = scmp.ne.s32.totalorder %s712_s10, %s708_s9  ;;  %p1113_p1 = scmp.eq.s32.totalorder %s761_s13, 0 }
   0x8   : > { %p90_p3 = scmp.eq.s32.totalorder %s477_s14, 1  ;;  %p478_p5 = scmp.ge.s32.totalorder %s720_s12, 1 }
   0x9   : > { %p770_p4 = por %p1113_p1, %p60_p0  ;;  %p97_p7 = scmp.lt.s32.totalorder %s720_s12, 3 }
   0xa   : > { %p775_p6 = por %p90_p3, %p60_p0  ;;  %s786_s18 = sadd.s32 1, %s720_s12  }
   0xb   : > { %s1116_s15 = scalar_select %p770_p4, 1, 0 }
   0xc   : > { %s1117_s16 = scalar_select %p775_p6, 1, 0 }
   0xd   : > { %p780_p8 = pnand %p478_p5, %p97_p7  ;;  %s44_s19 = ssub.s32 %s720_s12, %s786_s18 }
   0xe   : > { %s47_s20 = sadd.s32 1, %s716_s11  ;;  %p799_p12 = scmp.eq.s32.totalorder %s44_s19, 0 }
   0xf   : > { %p554_p10 = pneg %p780_p8  ;;  %p54_p13 = scmp.ne.s32.totalorder %s716_s11, %s712_s10 }
  0x10   : > { %p55_p0 = scmp.eq.s32.totalorder %s720_s12, 0  ;;  %p567_p3 = scmp.lt.s32.totalorder %s720_s12, 2 }
  0x11   : > { %p795_p11 = pnand %p554_p10, %p1113_p1  ;;  %s607_s25 = scalar_lea.hbm %s1110_s0, 16 }
  0x12   : > { %p608_p5 = scmp.ne.s32.totalorder %s1110_s0, %s607_s25  ;;  %p614_p1 = scmp.lt.u32.totalorder %s607_s25, %s1110_s0 }
  0x13   : > { %p609_p7 = pneg %p795_p11 }
  0x15   : > { %p610_p10 = pnand %p609_p7, %p608_p5 }
  0x17   : > { %p611_p9 = pneg %p610_p10 }
  0x19   : > { %p616_p2 = pnand %p614_p1, %p611_p9 }
  0x1b   : > { %619 = shalt.err (!%p616_p2)
}
  0x1c   : > { %s722_s30 = smov [#allocation2]   ;;  %p56_p1 = por %p55_p0, %p54_p13 }
  0x1d   : > { %557 = dma.hbm_to_smem (!%p795_p11), %s1110_s0, 16, %s722_s30, [#allocation5]  }
  0x1e   : > { %s826_s5 = scalar_select %p799_p12, %s716_s11, %s47_s20  }
  0x1f   : > { %p1121_p2 = scmp.eq.s32.totalorder %s761_s13, 1  ;;  %s119_s7 = sand.u32 1, %s716_s11  }
  0x20   : > { %s544_s8 = sshll.u32 %s720_s12, 6  ;;  %s481_s14 = sshll.u32 %s119_s7, 2 }
  0x21   : > { %p838_p9 = por %p1121_p2, %p54_p13  ;;  %s847_s23 = scalar_lea.hbm %s1111_s1, %s544_s8 }
  0x22   : > { %s123_s20 = scalar_lea.vmem [#allocation6], %s481_s14  ;;  %p851_p11 = pnand %p567_p3, %p56_p1 }
  0x23   : > { %s1122_s6 = scalar_select %p838_p9, 1, 0 }
  0x24   : > { %s131_s22 = sshll.u32 %s123_s20, 4  ;;  %s120_s25 = scalar_lea.sflag [#allocation3], %s119_s7  ;;  %s855_s22 = int_to_ptr.vmem [resolvable:$true] %s131_s22 }
  0x25   : > { %s620_s26 = scalar_lea.hbm %s847_s23, 64  ;;  %p622_p13 = pneg %p851_p11 }
  0x26   : > { %p621_p12 = scmp.ne.s32.totalorder %s847_s23, %s620_s26  ;;  %s625_s29 = scalar_lea.hbm %s1111_s1, 128 }
  0x27   : > { %p626_p3 = scmp.lt.u32.totalorder %s847_s23, %s1111_s1  ;;  %p627_p7 = scmp.lt.u32.totalorder %s625_s29, %s620_s26 }
  0x28   : > { %p623_p0 = pnand %p622_p13, %p621_p12  ;;  %p629_p1 = scmp.lt.u32.totalorder %s620_s26, %s847_s23 }
  0x29   : > { %p628_p10 = por %p627_p7, %p626_p3 }
  0x2a   : > { %p624_p5 = pneg %p623_p0 }
  0x2b   : > { %p630_p2 = por %p629_p1, %p628_p10 }
  0x2d   : > { %p631_p6 = pnand %p630_p2, %p624_p5 }
  0x2f   : > { %634 = shalt.err (!%p631_p6)
}
  0x30   : > { %s635_s4 = scalar_lea.vmem %s855_s22, 64  ;;  %s723_s7 = smov [#allocation6]  }
  0x31   : > { %p636_p12 = scmp.ne.s32.totalorder %s855_s22, %s635_s4  ;;  %s640_s8 = sshll.u32 %s723_s7, 4  ;;  %s641_s8 = int_to_ptr.vmem [resolvable:$false] %s640_s8 }
  0x32   : > { %s642_s14 = scalar_lea.vmem %s641_s8, 128  ;;  %p643_p4 = scmp.lt.s32.totalorder %s855_s22, %s641_s8 }
  0x33   : > { %p638_p0 = pnand %p636_p12, %p622_p13  ;;  %p644_p3 = scmp.lt.s32.totalorder %s642_s14, %s635_s4 }
  0x35   : > { %p639_p9 = pneg %p638_p0  ;;  %p645_p7 = por %p644_p3, %p643_p4 }
  0x37   : > { %p646_p10 = pnand %p645_p7, %p639_p9 }
  0x39   : > { %649 = shalt.err (!%p646_p10)
}
  0x3a   : > { %561 = dma.hbm_to_vmem [thread:$0]  (!%p851_p11), %s847_s23, 64, %s855_s22, %s120_s25  }
  0x3b   : > { %140 = sbr.rel (%p780_p8) target bundleno = 168 (0xa8), region = 28  ;;  %p1124_p6 = scmp.eq.s32.totalorder (!%p780_p8), %s761_s13, 0 }
  0x42   : > { %695 = dma.done.wait (%p1124_p6), [#allocation5], 16   ;;  %p1125_p13 = pmov %p1124_p6 }
  0x43   : > { %s889_s19 = sand.u32 1, %s712_s10   ;;  %p1126_p4 = scmp.ne.s32.totalorder %s1116_s15, 0 }
  0x44   : > { %697 = vsyncadd (%p1125_p13), [#allocation5], 4294967280  ;;  %s486_s21 = sshll.u32 %s889_s19, 2  ;;  %s147_s20 = scalar_lea.sflag [#allocation3], %s889_s19 }
  0x45   : > { %s150_s24 = scalar_lea.vmem [#allocation6], %s486_s21 }
  0x46   : > { %699 = dma.done.wait (%p1126_p4), %s147_s20, 64  }
  0x47   : > { %701 = vsyncadd (%p1126_p4), %s147_s20, 4294967232 }
  0x48   : > { %155 = sfence }
  0x49   : > { %s177_s17 = sld [smem:[#allocation2]]  ;;  %s489_s23 = sld [smem:[#allocation2 + $0x5]]  ;;  %v174_v0 = vld [vmem:[%s150_s24] ss:$2 sm:$0x3] }
  0x4a   : > { %s897_s22 = sld [smem:[#allocation2 + $0xa]]  ;;  %s491_s25 = sld [smem:[#allocation2 + $0x1]]  ;;  %v488_v1 = vld [vmem:[%s150_s24 + $0x1] ss:$2 sm:$0x3] }
  0x4b   : > { %s492_s26 = sld [smem:[#allocation2 + $0x6]]  ;;  %s899_s27 = sld [smem:[#allocation2 + $0xb]] }
  0x4c   : > { %s494_s28 = sld [smem:[#allocation2 + $0x2]]  ;;  %s495_s29 = sld [smem:[#allocation2 + $0x7]] }
  0x4d   : > { %s901_s30 = sld [smem:[#allocation2 + $0xc]]  ;;  %s903_s3 = sld [smem:[#allocation2 + $0x3]] }
  0x4e   : > { %s905_s15 = sld [smem:[#allocation2 + $0x8]]  ;;  %s907_s4 = sld [smem:[#allocation2 + $0xd]] }
  0x4f   : > { %v178_v2 = vstv %s177_s17  ;;  %v181_v4 = vstv %s489_s23  ;;  %s909_s7 = sld [smem:[#allocation2 + $0x4]]  ;;  %s911_s8 = sld [smem:[#allocation2 + $0x9]] }
  0x50   : > { %v179_v3 = vmul.f32 %v178_v2, %v174_v0  ;;  %v182_v5 = vmul.f32 %v488_v1, %v181_v4  ;;  %v189_v6 = vstv %s491_s25  ;;  %s913_s14 = sld [smem:[#allocation2 + $0xe]]  ;;  %s915_s21 = sld [smem:[#allocation2 + $0xf]]  ;;  %v185_v7 = vstv %s897_s22 }
  0x51   : > { %v190_v8 = vmul.f32 %v189_v6, %v174_v0  ;;  %v192_v9 = vstv %s492_s26  ;;  %v196_v10 = vstv %s899_s27  ;;  %s919_s20 = sld [smem:[#allocation2 + $0x14]]  ;;  %s921_s24 = sld [smem:[#allocation2 + $0x19]] }
  0x52   : > { %v183_v11 = vadd.f32 %v182_v5, %v179_v3  ;;  %v193_v12 = vmul.f32 %v488_v1, %v192_v9  ;;  %v200_v13 = vstv %s494_s28  ;;  %v203_v14 = vstv %s495_s29  ;;  %s923_s17 = sld [smem:[#allocation2 + $0x1e]]  ;;  %s925_s23 = sld [smem:[#allocation2 + $0x23]] }
  0x53   : > { %v201_v15 = vmul.f32 %v200_v13, %v174_v0  ;;  %v204_v16 = vmul.f32 %v488_v1, %v203_v14  ;;  %v207_v17 = vstv %s901_s30  ;;  %v211_v18 = vstv %s903_s3  ;;  %s929_s22 = sld [smem:[#allocation2 + $0x10]]  ;;  %s932_s25 = sld [smem:[#allocation2 + $0x15]] }
  0x54   : > { %v186_v19 = vadd.f32 %v185_v7, %v183_v11  ;;  %v194_v20 = vadd.f32 %v193_v12, %v190_v8  ;;  %v212_v21 = vmul.f32 %v211_v18, %v174_v0  ;;  %v214_v22 = vstv %s905_s15  ;;  %s934_s26 = sld [smem:[#allocation2 + $0x1a]]  ;;  %s938_s27 = sld [smem:[#allocation2 + $0x28]] }
  0x55   : > { %v205_v23 = vadd.f32 %v204_v16, %v201_v15  ;;  %v215_v24 = vmul.f32 %v488_v1, %v214_v22  ;;  %v218_v25 = vstv %s907_s4  ;;  %v222_v26 = vstv %s909_s7  ;;  %s943_s28 = sld [smem:[#allocation2 + $0x1f]]  ;;  %s945_s29 = sld [smem:[#allocation2 + $0x24]] }
  0x56   : > { %v940_v27 = vmax.f32 %v186_v19, 0.0  ;;  %v197_v28 = vadd.f32 %v196_v10, %v194_v20  ;;  %v223_v29 = vmul.f32 %v222_v26, %v174_v0  ;;  %v225_v30 = vstv %s911_s8  ;;  %s948_s30 = sld [smem:[#allocation2 + $0x11]]  ;;  %s955_s3 = sld [smem:[#allocation2 + $0x16]] }
  0x57   : > { %v208_v31 = vadd.f32 %v207_v17, %v205_v23  ;;  %v216_v32 = vadd.f32 %v215_v24, %v212_v21  ;;  %v226_v33 = vmul.f32 %v488_v1, %v225_v30  ;;  %v229_v34 = vstv %s913_s14  ;;  %s957_s15 = sld [smem:[#allocation2 + $0x1b]]  ;;  %s962_s4 = sld [smem:[#allocation2 + $0x29]] }
  0x58   : > { %v950_v35 = vmax.f32 %v197_v28, 0.0  ;;  %v233_v36 = vstv %s915_s21  ;;  %v236_v37 = vstv %s919_s20  ;;  %v240_v38 = vstv %s921_s24  ;;  %s967_s7 = sld [smem:[#allocation2 + $0x20]]  ;;  %s969_s8 = sld [smem:[#allocation2 + $0x25]] }
  0x59   : > { %v959_v39 = vmax.f32 %v208_v31, 0.0  ;;  %v219_v40 = vadd.f32 %v218_v25, %v216_v32  ;;  %v227_v41 = vadd.f32 %v226_v33, %v223_v29  ;;  %v234_v42 = vmul.f32 %v233_v36, %v940_v27  ;;  %s975_s14 = sld [smem:[#allocation2 + $0x12]]  ;;  %s980_s21 = sld [smem:[#allocation2 + $0x17]] }
  0x5a   : > { %v237_v43 = vmul.f32 %v236_v37, %v950_v35  ;;  %v244_v44 = vstv %s923_s17  ;;  %v248_v45 = vstv %s925_s23  ;;  %v256_v49 = vstv %s929_s22  ;;  %s982_s20 = sld [smem:[#allocation2 + $0x1c]]  ;;  %s992_s24 = sld [smem:[#allocation2 + $0x21]] }
  0x5b   : > { %v971_v46 = vmax.f32 %v219_v40, 0.0  ;;  %v230_v47 = vadd.f32 %v229_v34, %v227_v41  ;;  %v241_v48 = vmul.f32 %v240_v38, %v959_v39  ;;  %v257_v51 = vmul.f32 %v256_v49, %v940_v27  ;;  %s994_s17 = sld [smem:[#allocation2 + $0x26]]  ;;  %s999_s23 = sld [smem:[#allocation2 + $0x2a]] }
  0x5c   : > { %v238_v50 = vadd.f32 %v237_v43, %v234_v42  ;;  %v259_v52 = vstv %s932_s25  ;;  %v263_v53 = vstv %s934_s26  ;;  %v252_v59 = vstv %s938_s27  ;;  %s1004_s22 = sld [smem:[#allocation2 + $0x13]]  ;;  %s1006_s25 = sld [smem:[#allocation2 + $0x18]] }
  0x5d   : > { %v984_v54 = vmax.f32 %v230_v47, 0.0  ;;  %v245_v55 = vmul.f32 %v244_v44, %v971_v46  ;;  %v260_v56 = vmul.f32 %v259_v52, %v950_v35  ;;  %v264_v57 = vmul.f32 %v263_v53, %v959_v39  ;;  %s1014_s26 = sld [smem:[#allocation2 + $0x1d]]  ;;  %s1016_s27 = sld [smem:[#allocation2 + $0x22]] }
  0x5e   : > { %v242_v58 = vadd.f32 %v241_v48, %v238_v50  ;;  %v267_v60 = vstv %s943_s28  ;;  %v271_v61 = vstv %s945_s29  ;;  %v279_v3 = vstv %s948_s30  ;;  %s1020_s28 = sld [smem:[#allocation2 + $0x27]]  ;;  %s1025_s29 = sld [smem:[#allocation2 + $0x2b]] }
  0x5f   : > { %v249_v62 = vmul.f32 %v248_v45, %v984_v54  ;;  %v261_v63 = vadd.f32 %v260_v56, %v257_v51  ;;  %v268_v0 = vmul.f32 %v267_v60, %v971_v46  ;;  %v272_v1 = vmul.f32 %v271_v61, %v984_v54  ;;  %s1027_s30 = sld [smem:[#allocation2 + $0x2d]]  ;;  %p1127_p9 = scmp.ne.s32.totalorder %s1122_s6, 0 }
  0x60   : > { %v246_v2 = vadd.f32 %v245_v55, %v242_v58  ;;  %v282_v4 = vstv %s955_s3  ;;  %v286_v5 = vstv %s957_s15  ;;  %v280_v7 = vmul.f32 %v279_v3, %v940_v27  ;;  %s1031_s3 = sld [smem:[#allocation2 + $0x2e]]  ;;  %s1036_s15 = sld [smem:[#allocation2 + $0x2f]] }
  0x61   : > { %v265_v6 = vadd.f32 %v264_v57, %v261_v63  ;;  %v283_v8 = vmul.f32 %v282_v4, %v950_v35  ;;  %v287_v9 = vmul.f32 %v286_v5, %v959_v39  ;;  %v275_v11 = vstv %s962_s4  ;;  %s1042_s4 = sld [smem:[#allocation2 + $0x30]] }
  0x62   : > { %v250_v10 = vadd.f32 %v249_v62, %v246_v2  ;;  %v290_v12 = vstv %s967_s7  ;;  %v294_v13 = vstv %s969_s8  ;;  %v302_v19 = vstv %s975_s14  ;;  %s1046_s7 = sld [smem:[#allocation2 + $0x2c]]  ;;  %s537_s8 = sld [smem:[#allocation2 + $0x31]] }
  0x63   : > { %v269_v14 = vadd.f32 %v268_v0, %v265_v6  ;;  %v284_v15 = vadd.f32 %v283_v8, %v280_v7  ;;  %v291_v16 = vmul.f32 %v290_v12, %v971_v46  ;;  %v295_v17 = vmul.f32 %v294_v13, %v984_v54  ;;  %s538_s14 = sld [smem:[#allocation2 + $0x32]] }
  0x64   : > { %v253_v18 = vadd.f32 %v252_v59, %v250_v10  ;;  %v305_v20 = vstv %s980_s21  ;;  %v309_v21 = vstv %s982_s20  ;;  %v303_v24 = vmul.f32 %v302_v19, %v940_v27  ;;  %s487_s21 = sshll.u32 %s889_s19, 1  ;;  %s545_s20 = sshll.u32 %s761_s13, 5 }
  0x65   : > { %v273_v22 = vadd.f32 %v272_v1, %v269_v14  ;;  %v288_v23 = vadd.f32 %v287_v9, %v284_v15  ;;  %v306_v25 = vmul.f32 %v305_v20, %v950_v35  ;;  %v310_v26 = vmul.f32 %v309_v21, %v959_v39  ;;  %s724_s13 = smov [#allocation7]  }
  0x66   : > { %v313_v28 = vstv %s992_s24  ;;  %v317_v29 = vstv %s994_s17  ;;  %v254_v34 = vmax.f32 %v253_v18, 0.0  ;;  %v298_v36 = vstv %s999_s23  ;;  %s171_s24 = scalar_lea.vmem [#allocation7], %s487_s21 }
  0x67   : > { %v276_v30 = vadd.f32 %v275_v11, %v273_v22  ;;  %v292_v31 = vadd.f32 %v291_v16, %v288_v23  ;;  %v307_v32 = vadd.f32 %v306_v25, %v303_v24  ;;  %v314_v33 = vmul.f32 %v313_v28, %v971_v46  ;;  %s395_s17 = sshll.u32 %s171_s24, 4  ;;  %s1068_s17 = int_to_ptr.vmem [resolvable:$true] %s395_s17 }
  0x68   : > { %v325_v37 = vstv %s1004_s22  ;;  %v328_v38 = vstv %s1006_s25  ;;  %v318_v42 = vmul.f32 %v317_v29, %v984_v54  ;;  %v332_v47 = vstv %s1014_s26  ;;  %s1066_s25 = scalar_lea.hbm %s1112_s2, %s545_s20  ;;  %s381_s26 = scalar_lea.sflag [#allocation4], %s889_s19 }
  0x69   : > { %v296_v40 = vadd.f32 %v295_v17, %v292_v31  ;;  %v311_v41 = vadd.f32 %v310_v26, %v307_v32  ;;  %v326_v43 = vmul.f32 %v325_v37, %v940_v27  ;;  %v277_v44 = vmax.f32 %v276_v30, 0.0 }
  0x6a   : > { %v329_v45 = vmul.f32 %v328_v38, %v950_v35  ;;  %v336_v48 = vstv %s1016_s27  ;;  %v333_v51 = vmul.f32 %v332_v47, %v959_v39  ;;  %v340_v52 = vstv %s1020_s28  ;;  %s650_s27 = scalar_lea.vmem %s1068_s17, 32  ;;  %s654_s28 = sshll.u32 %s724_s13, 4  ;;  %s655_s28 = int_to_ptr.vmem [resolvable:$false] %s654_s28 }
  0x6b   : > { %v299_v49 = vadd.f32 %v298_v36, %v296_v40  ;;  %v315_v50 = vadd.f32 %v314_v33, %v311_v41  ;;  %v321_v53 = vstv %s1025_s29  ;;  %v337_v56 = vmul.f32 %v336_v48, %v971_v46  ;;  %p651_p8 = scmp.ne.s32.totalorder %s1068_s17, %s650_s27  ;;  %s656_s29 = scalar_lea.vmem %s655_s28, 64 }
  0x6c   : > { %v330_v55 = vadd.f32 %v329_v45, %v326_v43  ;;  %v348_v27 = vstv %s1027_s30  ;;  %v351_v60 = vstv %s1031_s3  ;;  %v341_v61 = vmul.f32 %v340_v52, %v984_v54  ;;  %p657_p1 = scmp.lt.s32.totalorder %s1068_s17, %s655_s28  ;;  %p658_p2 = scmp.lt.s32.totalorder %s656_s29, %s650_s27 }
  0x6d   : > { %v300_v57 = vmax.f32 %v299_v49, 0.0  ;;  %v319_v58 = vadd.f32 %v318_v42, %v315_v50  ;;  %v349_v59 = vmul.f32 %v348_v27, %v254_v34  ;;  %v352_v62 = vmul.f32 %v351_v60, %v277_v44  ;;  %p652_p11 = pnand %p651_p8, %p1127_p9 }
  0x6e   : > { %v334_v35 = vadd.f32 %v333_v51, %v330_v55  ;;  %v355_v63 = vstv %s1036_s15  ;;  %v359_v3 = vstv %s1042_s4  ;;  %v344_v5 = vstv %s1046_s7  ;;  %p659_p12 = por %p658_p2, %p657_p1 }
  0x6f   : > { %v322_v0 = vadd.f32 %v321_v53, %v319_v58  ;;  %v356_v39 = vmul.f32 %v355_v63, %v300_v57  ;;  %v353_v2 = vadd.f32 %v352_v62, %v349_v59  ;;  %v363_v9 = vstv %s537_s8  ;;  %p653_p5 = pneg %p652_p11 }
  0x70   : > { %v338_v1 = vadd.f32 %v337_v56, %v334_v35  ;;  %v367_v12 = vstv %s538_s14  ;;  %v375_v19 = vlaneseq }
  0x71   : > { %v323_v4 = vmax.f32 %v322_v0, 0.0  ;;  %v357_v6 = vadd.f32 %v356_v39, %v353_v2  ;;  %p660_p0 = pnand %p659_p12, %p653_p5 }
  0x72   : > { %v342_v46 = vadd.f32 %v341_v61, %v338_v1  ;;  %vm377_vm0 = vcmp.lt.s32.totalorder %v375_v19, 256 }
  0x73   : > { %v360_v7 = vmul.f32 %v359_v3, %v323_v4 }
  0x74   : > { %v345_v8 = vadd.f32 %v344_v5, %v342_v46 }
  0x75   : > { %v361_v11 = vadd.f32 %v360_v7, %v357_v6 }
  0x76   : > { %v346_v10 = vmax.f32 %v345_v8, 0.0 }
  0x78   : > { %v364_v54 = vmul.f32 %v363_v9, %v346_v10 }
  0x7a   : > { %v365_v13 = vadd.f32 %v364_v54, %v361_v11 }
  0x7c   : > { %v368_v14 = vadd.f32 %v367_v12, %v365_v13 }
  0x7e   : > { %v369_v15 = vsub.f32 0.0, %v368_v14 }
  0x80   : > { %v370_v16 = vmul.f32 1.442695, %v369_v15 }
  0x82   : > { %603 = vpow2.f32 %v370_v16 }
  0x8c   : > { %v604_v17 = vpop.eup %603 }
  0x8d   : > { %v372_v18 = vadd.f32 1.0, %v604_v17 }
  0x8f   : > { %605 = vrcp.f32 %v372_v18 }
  0x99   : > { %v606_v20 = vpop.eup %605 }
  0x9a   : > { %379 = vst.msk [vmem:[%s171_s24] sm:$0x3] %vm377_vm0, %v606_v20 }
  0x9b   : > { %663 = shalt.err (!%p660_p0)
}
  0x9c   : > { %s664_s19 = scalar_lea.hbm %s1066_s25, 32  ;;  %s668_s15 = scalar_lea.hbm %s1112_s2, 64 }
  0x9d   : > { %p665_p3 = scmp.ne.s32.totalorder %s1066_s25, %s664_s19  ;;  %p669_p6 = scmp.lt.u32.totalorder %s1066_s25, %s1112_s2 }
  0x9e   : > { %p670_p13 = scmp.lt.u32.totalorder %s668_s15, %s664_s19  ;;  %p672_p8 = scmp.lt.u32.totalorder %s664_s19, %s1066_s25 }
  0x9f   : > { %p666_p7 = pnand %p665_p3, %p1127_p9 }
  0xa0   : > { %p671_p4 = por %p670_p13, %p669_p6 }
  0xa1   : > { %p667_p10 = pneg %p666_p7 }
  0xa2   : > { %p673_p11 = por %p672_p8, %p671_p4 }
  0xa4   : > { %p674_p5 = pnand %p673_p11, %p667_p10 }
  0xa6   : > { %677 = shalt.err (!%p674_p5)
}
  0xa7   : > { %552 = dma.vmem_to_hbm [thread:$0]  (%p1127_p9), %s1068_s17, 32, %s1066_s25, %s381_s26  }
  0xa8 PF: > { %s407_s8 = sand.u32 1, %s708_s9   ;;  %p1128_p1 = scmp.ne.s32.totalorder %s1117_s16, 0 }
  0xa9   : > { %p1129_p2 = scmp.ge.s32.totalorder %s720_s12, 2  ;;  %s408_s14 = scalar_lea.sflag [#allocation4], %s407_s8 }
  0xab   : > { %p563_p12 = pnand %p1129_p2, %p1128_p1 }
  0xad   : > { %703 = dma.done.wait (!%p563_p12), %s408_s14, 32  }
  0xae   : > { %705 = vsyncadd (!%p563_p12), %s408_s14, 4294967264  ;;  %p16_p0 = scmp.ge.s32.totalorder %s786_s18, 4   ;;  %s1130_s9 = smov %s712_s10 }
  0xaf   : > { %s1131_s10 = smov %s716_s11  ;;  %s1132_s11 = smov %s826_s5 }
  0xb0   : > { %s1133_s12 = smov %s786_s18  ;;  %18 = sbr.rel (!%p16_p0) target bundleno = 6 (0x6), region = 79 }
  0xb7   :  { %413 = vsyncpa [#allocation3], 1 }
  0xb8   :  { %415 = vsyncpa [#allocation3 + $0x1], 1 }
  0xb9   :  { %416 = vsyncpa [#allocation4], 1 }
  0xba   :  { %418 = vsyncpa [#allocation4 + $0x1], 1 }
  0xbb   :  { %419 = vsyncpa [#allocation5], 1 }
  0xbc   :  { %421 = vsyncpa [#allocation5 + $0x1], 1 }

</bundles_post_ra>
